<compile_context>
chip_gen: v5e
topology: v5e:2x2
jax: 0.10.0
libtpu: 0.0.40
codegen_flags: <defaults>
</compile_context>

<pallas_src>
import jax
import jax.numpy as jnp
from jax import lax
from jax.experimental import pallas as pl
from jax.experimental.pallas import tpu as pltpu


# ----------------------------------------------------------------------------- helpers

def _round_up(x, m):
    return (x + m - 1) // m * m


_GATE_REORDER = (0, 1, 3, 2)   # torch order [i, f, g, o] -> kernel order [i, f, o, g]


def _vmem_limit_bytes():
    """Generation-specific VMEM budget: ~3/4 of physical (≈96 MiB v5e/v6e, ≈48 MiB v7x)."""
    try:
        cap = getattr(pltpu.get_tpu_info(), "vmem_capacity_bytes", None)
        if cap:
            return int(cap) * 3 // 4
    except Exception:
        pass
    return 48 * 1024 * 1024      # safe fallback on every generation


def _pick_batch_tile(Bp):
    """Batch tile for the recurrence: fill the MXU rows, keep >=2 tiles on dual-TC chips."""
    try:
        kind = jax.devices()[0].device_kind.lower()
    except Exception:
        kind = ""
    mxu_rows = 128 if "v5" in kind else 256            # v5e MXU is 128-wide; v6e/v7x are 256
    dual_tc = ("v7" in kind) or ("7x" in kind)         # v7x: 2 TensorCores per chip
    bb = min(Bp, mxu_rows)
    while dual_tc and bb > 16 and Bp // bb < 2:        # let the "parallel" bt axis use both TCs
        bb //= 2
    return bb


# ----------------------------------------------------------------------------- kernels

def matmul_bias_kernel(a_ref, b_ref, bias_ref, o_ref):
    """One output tile of  A @ B + bias  (full-K, f32 accumulation on the MXU)."""
    o_ref[...] = (jnp.dot(a_ref[...], b_ref[...],
                          preferred_element_type=jnp.float32)
                  + bias_ref[...]).astype(o_ref.dtype)


def pallas_matmul_bias(a, b, bias, out_dtype=jnp.float32, tm=None, tn=None,
                       vmem_limit=None):
    """Tiled MXU matmul (M, K) @ (K, N) + (1, N).

    tm=None -> A (and the output rows) kept fully resident, grid only over N tiles.
    tn=None -> B and bias kept fully resident, grid only over M tiles.
    Both set -> standard 2-D tiling (fallback for very large operands).
    A resident / constant-index operand is DMA'd from HBM exactly once.
    """
    M, K = a.shape
    K2, N = b.shape
    assert K == K2 and bias.shape == (1, N)

    tm_ = M if tm is None else min(tm, M)
    tn_ = N if tn is None else min(tn, N)
    Mp = _round_up(M, tm_)
    Np = _round_up(N, tn_)
    if Mp != M:
        a = jnp.pad(a, ((0, Mp - M), (0, 0)))
    if Np != N:
        b = jnp.pad(b, ((0, 0), (0, Np - N)))
        bias = jnp.pad(bias, ((0, 0), (0, Np - N)))

    out = pl.pallas_call(
        matmul_bias_kernel,
        out_shape=jax.ShapeDtypeStruct((Mp, Np), out_dtype),
        grid_spec=pltpu.PrefetchScalarGridSpec(
            num_scalar_prefetch=0,
            grid=(Mp // tm_, Np // tn_),
            in_specs=[
                pl.BlockSpec((tm_, K), lambda i, j: (i, 0)),
                pl.BlockSpec((K, tn_), lambda i, j: (0, j)),
                pl.BlockSpec((1, tn_), lambda i, j: (0, j)),
            ],
            out_specs=pl.BlockSpec((tm_, tn_), lambda i, j: (i, j)),
        ),
        compiler_params=pltpu.CompilerParams(
            dimension_semantics=("parallel", "parallel"),
            vmem_limit_bytes=vmem_limit),
    )(a, b, bias)
    return out[:M, :N]


def lstm_recurrence_kernel(gx_ref, whh_ref, h_out_ref, h_sc, c_sc):
    """One (batch-tile, time-block) grid point: TT sequential LSTM steps.

    gx_ref   : (BB, TT, 4Hp) bf16 -- precomputed x_t @ W_ih + b, gate order [i, f, o, g]
    whh_ref  : (Hp, 4Hp)     bf16 -- resident recurrent weights (constant index_map)
    h_out_ref: (BB, TT, Hp)  bf16 -- h_t, emitted batch-major (feeds phase 3 with no transpose)
    h_sc     : (BB, Hp)      bf16 -- hidden state carried across the time-block grid axis
    c_sc     : (BB, Hp)      f32  -- cell state carried across the time-block grid axis
    """
    tb = pl.program_id(1)
    TT = gx_ref.shape[1]
    Hp = h_sc.shape[-1]

    @pl.when(tb == 0)
    def _():
        h_sc[...] = jnp.zeros_like(h_sc)
        c_sc[...] = jnp.zeros_like(c_sc)

    h = h_sc[...]            # bf16 (matmul operand dtype; avoids per-step casts)
    c = c_sc[...]            # f32  (accuracy of the cell state)

    # Static Python loop == fully unrolled (the fori_loop(unroll=True) equivalent); static `tt`
    # keeps the per-step gx read / h_out write as cheap static sub-tile slices of the VMEM block.
    for tt in range(TT):
        gates = gx_ref[:, tt, :].astype(jnp.float32) + jnp.dot(
            h, whh_ref[...], preferred_element_type=jnp.float32)
        # [i, f, o] are contiguous -> one wide sigmoid; g is the trailing tanh gate.
        sig = jax.nn.sigmoid(gates[:, :3 * Hp])
        i_g = sig[:, 0 * Hp:1 * Hp]
        f_g = sig[:, 1 * Hp:2 * Hp]
        o_g = sig[:, 2 * Hp:3 * Hp]
        g_g = jnp.tanh(gates[:, 3 * Hp:])
        c = f_g * c + i_g * g_g                       # f32 elementwise (v5e-friendly)
        h = (o_g * jnp.tanh(c)).astype(jnp.bfloat16)
        h_out_ref[:, tt, :] = h

    h_sc[...] = h
    c_sc[...] = c


# ----------------------------------------------------------------------------- params

def init_params(key, embed_size, hidden_size, vocab_size):
    """Torch-layout parameters (same shapes as the nn.Module's state dict)."""
    kE, k1, k2, k3, k4, k5 = jax.random.split(key, 6)

    def xavier_uniform(k, shape):
        fan_out, fan_in = shape
        limit = (6.0 / (fan_in + fan_out)) ** 0.5
        return jax.random.uniform(k, shape, jnp.float32, -limit, limit)

    H = hidden_size
    s = 1.0 / (H ** 0.5)
    return {
        "embedding": xavier_uniform(kE, (vocab_size, embed_size)),      # (V, E)
        "w_ih": jax.random.uniform(k1, (4 * H, embed_size), jnp.float32, -s, s),
        "w_hh": jax.random.uniform(k2, (4 * H, H), jnp.float32, -s, s),
        "b_ih": jax.random.uniform(k3, (4 * H,), jnp.float32, -s, s),
        "b_hh": jax.random.uniform(k4, (4 * H,), jnp.float32, -s, s),
        "fc_w": xavier_uniform(k5, (vocab_size, hidden_size)),          # (V, H)
        "fc_b": jnp.zeros((vocab_size,), jnp.float32),
    }


def prepare_kernel_params(params):
    """Repack torch-layout params: transpose, reorder gates to [i,f,o,g], lane-pad, bf16-cast.

    Invariant: all padded gate columns / bias entries / W_hh padded rows are exactly 0, so
    padded hidden units stay exactly 0 through the recurrence.
    """
    w_ih_t = params["w_ih"]                  # (4H, E)
    w_hh_t = params["w_hh"]                  # (4H, H)
    fc_w_t = params["fc_w"]                  # (V, H)
    fc_b = params["fc_b"]                    # (V,)

    fourH, E = w_ih_t.shape
    H = fourH // 4
    V = fc_w_t.shape[0]

    Ep = _round_up(E, 128)
    Hp = _round_up(H, 128)
    Vp = _round_up(V, 128)
    order = jnp.array(_GATE_REORDER)

    def repack(w, in_dim, in_dim_p):
        # (4H, in_dim) -> (in_dim_p, 4*Hp), zero padded; padded gate columns stay exactly 0.
        w = w.reshape(4, H, in_dim)[order]
        w = jnp.pad(w, ((0, 0), (0, Hp - H), (0, in_dim_p - in_dim)))
        return jnp.transpose(w, (2, 0, 1)).reshape(in_dim_p, 4 * Hp)

    b = (params["b_ih"] + params["b_hh"]).reshape(4, H)[order]
    b = jnp.pad(b, ((0, 0), (0, Hp - H))).reshape(1, 4 * Hp)

    fc_w = jnp.pad(fc_w_t.T, ((0, Hp - H), (0, Vp - V)))                # (Hp, Vp)
    fc_bp = jnp.pad(fc_b, (0, Vp - V))[None, :]                         # (1, Vp)

    return {
        "w_ih": repack(w_ih_t, E, Ep).astype(jnp.bfloat16),             # (Ep, 4Hp)
        "w_hh": repack(w_hh_t, H, Hp).astype(jnp.bfloat16),             # (Hp, 4Hp)
        "b": b.astype(jnp.float32),                                     # (1, 4Hp)
        "fc_w": fc_w.astype(jnp.bfloat16),                              # (Hp, Vp)
        "fc_b": fc_bp.astype(jnp.float32),                              # (1, Vp)
        "E": E, "H": H, "V": V, "Ep": Ep, "Hp": Hp, "Vp": Vp,
    }


# ----------------------------------------------------------------------------- forward

def decoder_rnn_forward(features, captions, params):
    """features: (B, E) f32, captions: (B, L) int32 -> logits (B, L, V) f32."""
    B, E = features.shape
    kp = prepare_kernel_params(params)
    Ep, Hp, Vp, V = kp["Ep"], kp["Hp"], kp["Vp"], kp["V"]
    vmem_limit = _vmem_limit_bytes()

    # Glue: embedding gather + image-feature concat; everything stays batch-major so the
    # Hp- and Vp-sized tensors are never transposed.
    emb = jnp.take(params["embedding"], captions[:, :-1], axis=0)        # (B, L-1, E)
    x = jnp.concatenate([features[:, None, :], emb], axis=1).astype(jnp.float32)
    T = x.shape[1]

    TT = 8                                      # timesteps per recurrence grid step
    Tp = _round_up(T, TT)
    Bp = _round_up(B, 16)                       # sublane / bf16 packing
    BB = _pick_batch_tile(Bp)                   # MXU-row fill + dual-TC sharding on v7x
    Bp = _round_up(Bp, BB)

    x = jnp.pad(x, ((0, Bp - B), (0, Tp - T), (0, Ep - E)))              # (Bp, Tp, Ep)

    # Phase 1: batched input projection over all timesteps, W_ih + bias resident (grid over M
    # only), bf16 output (halves the HBM traffic of the largest intermediate).
    gates_x = pallas_matmul_bias(
        x.reshape(Bp * Tp, Ep).astype(jnp.bfloat16),
        kp["w_ih"], kp["b"], out_dtype=jnp.bfloat16,
        tm=min(512, Bp * Tp), tn=None, vmem_limit=vmem_limit)            # (Bp*Tp, 4Hp) bf16
    gates_x = gates_x.reshape(Bp, Tp, 4 * Hp)

    # Phase 2: sequential LSTM recurrence. Batch tiles "parallel", time blocks "arbitrary";
    # TT steps per grid step amortize the per-step grid overhead; W_hh resident; h_all is
    # emitted batch-major so no transpose pass is needed before the vocab projection.
    h_all = pl.pallas_call(
        lstm_recurrence_kernel,
        out_shape=jax.ShapeDtypeStruct((Bp, Tp, Hp), jnp.bfloat16),
        grid_spec=pltpu.PrefetchScalarGridSpec(
            num_scalar_prefetch=0,
            grid=(Bp // BB, Tp // TT),
            in_specs=[
                pl.BlockSpec((BB, TT, 4 * Hp), lambda bt, tb: (bt, tb, 0)),
                pl.BlockSpec((Hp, 4 * Hp), lambda bt, tb: (0, 0)),       # resident weights
            ],
            out_specs=pl.BlockSpec((BB, TT, Hp), lambda bt, tb: (bt, tb, 0)),
            scratch_shapes=[
                pltpu.VMEM((BB, Hp), jnp.bfloat16),                      # h state (bf16)
                pltpu.VMEM((BB, Hp), jnp.float32),                       # c state (f32)
            ]),
        compiler_params=pltpu.CompilerParams(
            dimension_semantics=("parallel", "arbitrary"),
            vmem_limit_bytes=vmem_limit),
    )(gates_x, kp["w_hh"])

    # Phase 3: vocab projection. Keep the h activation slab resident (grid over Vp tiles only,
    # fc_w read exactly once) when it comfortably fits VMEM; else 2-D tiling with a large tm.
    h_flat = h_all.reshape(Bp * Tp, Hp)                                  # free reshape (batch-major)
    if Bp * Tp * Hp * 2 <= 8 * 1024 * 1024:
        logits = pallas_matmul_bias(h_flat, kp["fc_w"], kp["fc_b"],
                                    out_dtype=jnp.float32, tm=None, tn=256,
                                    vmem_limit=vmem_limit)
    else:
        logits = pallas_matmul_bias(h_flat, kp["fc_w"], kp["fc_b"],
                                    out_dtype=jnp.float32, tm=512, tn=256,
                                    vmem_limit=vmem_limit)
    return logits.reshape(Bp, Tp, Vp)[:B, :T, :V]                        # strip padding


# TODO(synk): the autoregressive `sample()` method (greedy decode loop with data-dependent
# early stop) is host-driven control flow and is not implemented as a Pallas kernel here.


# ----------------------------------------------------------------------------- reference

def _reference_forward(features, captions, params):
    """Pure-JAX reference (torch gate order), mirroring the kernel's bf16 matmul operands."""
    emb = jnp.take(params["embedding"], captions[:, :-1], axis=0)
    x = jnp.concatenate([features[:, None, :], emb], axis=1)             # (B, T, E)
    B = x.shape[0]
    H = params["w_hh"].shape[1]
    bf = jnp.bfloat16

    w_ih = params["w_ih"].T.astype(bf)     # (E, 4H)
    w_hh = params["w_hh"].T.astype(bf)     # (H, 4H)
    b = (params["b_ih"] + params["b_hh"])[None, :]
    fc_w = params["fc_w"].T.astype(bf)     # (H, V)
    fc_b = params["fc_b"][None, :]

    def step(carry, x_t):
        h, c = carry
        gates = (jnp.dot(x_t.astype(bf), w_ih, preferred_element_type=jnp.float32)
                 + jnp.dot(h.astype(bf), w_hh, preferred_element_type=jnp.float32)
                 + b)
        i = jax.nn.sigmoid(gates[:, 0 * H:1 * H])
        f = jax.nn.sigmoid(gates[:, 1 * H:2 * H])
        g = jnp.tanh(gates[:, 2 * H:3 * H])
        o = jax.nn.sigmoid(gates[:, 3 * H:4 * H])
        c = f * c + i * g
        h = o * jnp.tanh(c)
        y = jnp.dot(h.astype(bf), fc_w, preferred_element_type=jnp.float32) + fc_b
        return (h, c), y

    h0 = jnp.zeros((B, H), jnp.float32)
    c0 = jnp.zeros((B, H), jnp.float32)
    _, ys = lax.scan(step, (h0, c0), jnp.transpose(x, (1, 0, 2)))
    return jnp.transpose(ys, (1, 0, 2))


# ----------------------------------------------------------------------------- main

if __name__ == "__main__":
    embed_size = 32
    hidden_size = 32
    vocab_size = 40
    batch = 2
    cap_len = 8            # forward uses captions[:, :-1] -> T = 1 + (cap_len - 1) = 8

    key = jax.random.PRNGKey(0)
    k_params, k_feat, k_cap = jax.random.split(key, 3)

    params = init_params(k_params, embed_size, hidden_size, vocab_size)
    features = jax.random.normal(k_feat, (batch, embed_size), jnp.float32)
    captions = jax.random.randint(k_cap, (batch, cap_len), 0, vocab_size,
                                  dtype=jnp.int32)

    out = decoder_rnn_forward(features, captions, params)
    out = jax.block_until_ready(out)

    ref = _reference_forward(features, captions, params)
    assert out.shape == (batch, cap_len, vocab_size), out.shape
    assert jnp.allclose(out, ref, atol=2e-2, rtol=2e-2), float(jnp.max(jnp.abs(out - ref)))

    print("KERNEL_OK")
</pallas_src>

<mosaic_0001>
module attributes {stable_mosaic.version = 11 : i64} {
  func.func @matmul_bias_kernel(%arg0: i32, %arg1: i32, %arg2: memref<128x128xbf16, #tpu.memory_space<vmem>>, %arg3: memref<128x512xbf16, #tpu.memory_space<vmem>>, %arg4: memref<1x512xf32, #tpu.memory_space<vmem>>, %arg5: memref<128x512xbf16, #tpu.memory_space<vmem>>) attributes {dimension_semantics = [#tpu.dimension_semantics<parallel>, #tpu.dimension_semantics<parallel>], iteration_bounds = array<i64: 1, 1>, scalar_prefetch = 0 : i64, scratch_operands = 0 : i64, tpu.core_type = #tpu.core_type<tc>, window_params = [{transform_indices = @transform_0, window_bounds = array<i64: 128, 128>}, {transform_indices = @transform_1, window_bounds = array<i64: 128, 512>}, {transform_indices = @transform_2, window_bounds = array<i64: 1, 512>}, {transform_indices = @transform_3, window_bounds = array<i64: 128, 512>}]} {
    %c0 = arith.constant 0 : index
    %c0_0 = arith.constant 0 : index
    %0 = vector.load %arg2[%c0, %c0_0] : memref<128x128xbf16, #tpu.memory_space<vmem>>, vector<128x128xbf16>
    %c0_1 = arith.constant 0 : index
    %c0_2 = arith.constant 0 : index
    %1 = vector.load %arg3[%c0_1, %c0_2] : memref<128x512xbf16, #tpu.memory_space<vmem>>, vector<128x512xbf16>
    %cst = arith.constant dense<0.000000e+00> : vector<128x512xf32>
    %2 = tpu.matmul %0, %1, %cst {dimension_numbers = #tpu.dot_dimension_numbers<[1], [0], [0], [1], [0, 0, 1, 1], [], []>} : vector<128x128xbf16>, vector<128x512xbf16>, vector<128x512xf32> -> vector<128x512xf32>
    %c0_3 = arith.constant 0 : index
    %c0_4 = arith.constant 0 : index
    %3 = vector.load %arg4[%c0_3, %c0_4] : memref<1x512xf32, #tpu.memory_space<vmem>>, vector<1x512xf32>
    %4 = vector.broadcast %3 : vector<1x512xf32> to vector<128x512xf32>
    %5 = arith.addf %2, %4 : vector<128x512xf32>
    %6 = arith.truncf %5 : vector<128x512xf32> to vector<128x512xbf16>
    %c0_5 = arith.constant 0 : index
    %c0_6 = arith.constant 0 : index
    %7 = vector.load %arg5[%c0_5, %c0_6] : memref<128x512xbf16, #tpu.memory_space<vmem>>, vector<128x512xbf16>
    tpu.vector_store %arg5[%c0_5, %c0_6], %6 {strides = array<i32>} : memref<128x512xbf16, #tpu.memory_space<vmem>>, vector<128x512xbf16>,
    return
  }
  func.func @transform_0(%arg0: i32, %arg1: i32) -> (i32, i32) {
    %c0_i32 = arith.constant 0 : i32
    %c0_i32_0 = arith.constant 0 : i32
    return %arg0, %c0_i32 : i32, i32
  }
  func.func @transform_1(%arg0: i32, %arg1: i32) -> (i32, i32) {
    %c0_i32 = arith.constant 0 : i32
    %c0_i32_0 = arith.constant 0 : i32
    return %c0_i32, %arg1 : i32, i32
  }
  func.func @transform_2(%arg0: i32, %arg1: i32) -> (i32, i32) {
    %c0_i32 = arith.constant 0 : i32
    %c0_i32_0 = arith.constant 0 : i32
    return %c0_i32, %arg1 : i32, i32
  }
  func.func @transform_3(%arg0: i32, %arg1: i32) -> (i32, i32) {
    %c0_i32 = arith.constant 0 : i32
    return %arg0, %arg1 : i32, i32
  }
}

</mosaic_0001>

<bundles_post_ra>
// kernel: tpu_custom_call.1
= control target key start
LH: loop header
LB: loop body
LE: loop exit
PB: predicated region body
PF: predicated region fallthrough
CT: control target
= control target key end

     0   :  { %8 = vsyncpa [#allocation3], 0  ;;  %s1034_s0 = inlined_call_operand.hbm [shape: bf16[128,128], index: 0, kind: input, shape index: {}]   ;;  %s1035_s1 = inlined_call_operand.hbm [shape: bf16[128,512], index: 1, kind: input, shape index: {}]   ;;  %s1036_s2 = inlined_call_operand.hbm [shape: f32[1,512], index: 2, kind: input, shape index: {}]   ;;  %s1037_s3 = inlined_call_operand.hbm [shape: bf16[128,512], index: 3, kind: output, shape index: {}]  }
   0x1   :  { %9 = vsyncpa [#allocation6], 0  ;;  %s28_s14 = sshll.u32 %s1035_s1, 4  ;;  %s29_s14 = int_to_ptr.hbm [resolvable:$true] %s28_s14 }
   0x2   :  { %10 = vsyncpa [#allocation4], 0  ;;  %s916_s15 = smov [#allocation5]   ;;  %s15_s19 = sshll.u32 %s1034_s0, 4  ;;  %s16_s19 = int_to_ptr.hbm [resolvable:$true] %s15_s19 }
   0x3   :  { %s30_s16 = sshll.u32 %s916_s15, 4  ;;  %s917_s20 = smov 256   ;;  %s31_s16 = int_to_ptr.vmem [resolvable:$true] %s30_s16 }
   0x4   :  { %s918_s21 = smov 16   ;;  %s919_s22 = smov [#allocation2]  }
   0x5   :  { %36 = dma.hbm_to_vmem [thread:$0]  %s29_s14, 4096, %s31_s16, [#allocation6], %s917_s20, %s917_s20, %s918_s21  }
   0x6   :  { %s17_s23 = sshll.u32 %s919_s22, 4  ;;  %s920_s1 = smov 64   ;;  %s18_s23 = int_to_ptr.vmem [resolvable:$true] %s17_s23 }
   0x7   :  { %s921_s24 = smov 4   ;;  %s42_s27 = sshll.u32 %s1036_s2, 4  ;;  %s43_s27 = int_to_ptr.hbm [resolvable:$true] %s42_s27 }
   0x8   :  { %23 = dma.hbm_to_vmem [thread:$0]  %s16_s19, 1024, %s18_s23, [#allocation3], %s920_s1, %s920_s1, %s921_s24  }
   0x9   :  { %s922_s28 = smov [#allocation7]  }
   0xa   :  { %s44_s0 = sshll.u32 %s922_s28, 4  ;;  %s45_s0 = int_to_ptr.vmem [resolvable:$true] %s44_s0 }
   0xb   :  { %47 = dma.hbm_to_vmem [thread:$0]  %s43_s27, 64, %s45_s0, [#allocation6]  }
   0xc   :  { %910 = dma.done.wait [#allocation3], 1024  }
   0xd   :  { %911 = vsyncadd [#allocation3], 4294966272 }
   0xe   :  { %912 = dma.done.wait [#allocation6], 4160  }
   0xf   :  { %913 = vsyncadd [#allocation6], 4294963136  ;;  %v752_v0 = vld [vmem:[#allocation5 + $0xe0] sm:$0xf]  ;;  %v804_v1 = vld [vmem:[#allocation5 + $0xec] sm:$0xf0] }
  0x10   :  { %v802_v2 = vld [vmem:[#allocation5 + $0xe4] sm:$0xf]  ;;  %v753_v3 = vor.u32 %v804_v1, %v752_v0  ;;  %v754_v4 = vld [vmem:[#allocation5 + $0xf0] sm:$0xf0]  ;;  %v760_v5 = vld [vmem:[#allocation5 + $0xe8] sm:$0xf] }
  0x11   :  { %v805_v6 = vld [vmem:[#allocation5 + $0xf4] sm:$0xf0]  ;;  %v757_v7 = vor.u32 %v802_v2, %v754_v4  ;;  %v803_v9 = vld [vmem:[#allocation5 + $0xec] sm:$0xf]  ;;  %v762_v10 = vld [vmem:[#allocation5 + $0xf8] sm:$0xf0] }
  0x12   :  { %v761_v8 = vor.u32 %v805_v6, %v760_v5  ;;  %v736_v11 = vld [vmem:[#allocation5 + $0xc0] sm:$0xf]  ;;  %326 = vmatpush.bf16.msra.mxu0 %v753_v3  ;;  %v765_v12 = vor.u32 %v803_v9, %v762_v10  ;;  %v800_v13 = vld [vmem:[#allocation5 + $0xcc] sm:$0xf0]  ;;  %v798_v14 = vld [vmem:[#allocation5 + $0xc4] sm:$0xf] }
  0x13   :  { %v738_v15 = vld [vmem:[#allocation5 + $0xd0] sm:$0xf0]  ;;  %375 = vmatpush.bf16.msra.mxu1 %v757_v7  ;;  %v737_v16 = vor.u32 %v800_v13, %v736_v11  ;;  %v744_v18 = vld [vmem:[#allocation5 + $0xc8] sm:$0xf]  ;;  %v801_v19 = vld [vmem:[#allocation5 + $0xd4] sm:$0xf0] }
  0x14   :  { %424 = vmatpush.bf16.msra.mxu2 %v761_v8  ;;  %v741_v17 = vor.u32 %v798_v14, %v738_v15  ;;  %v799_v20 = vld [vmem:[#allocation5 + $0xcc] sm:$0xf]  ;;  %473 = vmatpush.bf16.msra.mxu3 %v765_v12  ;;  %v745_v21 = vor.u32 %v801_v19, %v744_v18  ;;  %v746_v22 = vld [vmem:[#allocation5 + $0xd8] sm:$0xf0]  ;;  %v720_v23 = vld [vmem:[#allocation5 + $0xa0] sm:$0xf] }
  0x15   :  { %v796_v24 = vld [vmem:[#allocation5 + $0xac] sm:$0xf0]  ;;  %v749_v25 = vor.u32 %v799_v20, %v746_v22  ;;  %v794_v26 = vld [vmem:[#allocation5 + $0xa4] sm:$0xf]  ;;  %v722_v27 = vld [vmem:[#allocation5 + $0xb0] sm:$0xf0] }
  0x16   :  { %v728_v28 = vld [vmem:[#allocation5 + $0xa8] sm:$0xf]  ;;  %327 = vmatpush.bf16.msra.mxu0 %v737_v16  ;;  %v721_v29 = vor.u32 %v796_v24, %v720_v23  ;;  %v797_v30 = vld [vmem:[#allocation5 + $0xb4] sm:$0xf0]  ;;  %v795_v31 = vld [vmem:[#allocation5 + $0xac] sm:$0xf]  ;;  %v725_v33 = vor.u32 %v794_v26, %v722_v27 }
  0x17   :  { %v730_v32 = vld [vmem:[#allocation5 + $0xb8] sm:$0xf0]  ;;  %376 = vmatpush.bf16.msra.mxu1 %v741_v17  ;;  %v729_v34 = vor.u32 %v797_v30, %v728_v28  ;;  %v704_v35 = vld [vmem:[#allocation5 + $0x80] sm:$0xf]  ;;  %v792_v36 = vld [vmem:[#allocation5 + $0x8c] sm:$0xf0] }
  0x18   :  { %425 = vmatpush.bf16.msra.mxu2 %v745_v21  ;;  %v790_v37 = vld [vmem:[#allocation5 + $0x84] sm:$0xf]  ;;  %474 = vmatpush.bf16.msra.mxu3 %v749_v25  ;;  %v733_v38 = vor.u32 %v795_v31, %v730_v32  ;;  %v706_v39 = vld [vmem:[#allocation5 + $0x90] sm:$0xf0]  ;;  %v712_v40 = vld [vmem:[#allocation5 + $0x88] sm:$0xf]  ;;  %v705_v44 = vor.u32 %v792_v36, %v704_v35 }
  0x19   :  { %v793_v41 = vld [vmem:[#allocation5 + $0x94] sm:$0xf0]  ;;  %v791_v42 = vld [vmem:[#allocation5 + $0x8c] sm:$0xf]  ;;  %v714_v43 = vld [vmem:[#allocation5 + $0x98] sm:$0xf0]  ;;  %v709_v45 = vor.u32 %v790_v37, %v706_v39 }
  0x1a   :  { %328 = vmatpush.bf16.msra.mxu0 %v721_v29  ;;  %v713_v46 = vor.u32 %v793_v41, %v712_v40  ;;  %v688_v47 = vld [vmem:[#allocation5 + $0x60] sm:$0xf]  ;;  %v788_v48 = vld [vmem:[#allocation5 + $0x6c] sm:$0xf0]  ;;  %v786_v49 = vld [vmem:[#allocation5 + $0x64] sm:$0xf]  ;;  %v717_v50 = vor.u32 %v791_v42, %v714_v43 }
  0x1b   :  { %377 = vmatpush.bf16.msra.mxu1 %v725_v33  ;;  %v690_v51 = vld [vmem:[#allocation5 + $0x70] sm:$0xf0]  ;;  %v696_v52 = vld [vmem:[#allocation5 + $0x68] sm:$0xf]  ;;  %v789_v53 = vld [vmem:[#allocation5 + $0x74] sm:$0xf0]  ;;  %v689_v56 = vor.u32 %v788_v48, %v688_v47 }
  0x1c   :  { %426 = vmatpush.bf16.msra.mxu2 %v729_v34  ;;  %475 = vmatpush.bf16.msra.mxu3 %v733_v38  ;;  %v787_v54 = vld [vmem:[#allocation5 + $0x6c] sm:$0xf]  ;;  %v698_v55 = vld [vmem:[#allocation5 + $0x78] sm:$0xf0]  ;;  %v693_v57 = vor.u32 %v786_v49, %v690_v51  ;;  %v697_v58 = vor.u32 %v789_v53, %v696_v52  ;;  %v672_v59 = vld [vmem:[#allocation5 + $0x40] sm:$0xf] }
  0x1d   :  { %v784_v60 = vld [vmem:[#allocation5 + $0x4c] sm:$0xf0]  ;;  %v782_v61 = vld [vmem:[#allocation5 + $0x44] sm:$0xf]  ;;  %v701_v62 = vor.u32 %v787_v54, %v698_v55  ;;  %v674_v63 = vld [vmem:[#allocation5 + $0x50] sm:$0xf0] }
  0x1e   :  { %329 = vmatpush.bf16.msra.mxu0 %v705_v44  ;;  %v680_v0 = vld [vmem:[#allocation5 + $0x48] sm:$0xf]  ;;  %v785_v1 = vld [vmem:[#allocation5 + $0x54] sm:$0xf0]  ;;  %v783_v2 = vld [vmem:[#allocation5 + $0x4c] sm:$0xf]  ;;  %v673_v4 = vor.u32 %v784_v60, %v672_v59  ;;  %v677_v5 = vor.u32 %v782_v61, %v674_v63 }
  0x1f   :  { %378 = vmatpush.bf16.msra.mxu1 %v709_v45  ;;  %v682_v3 = vld [vmem:[#allocation5 + $0x58] sm:$0xf0]  ;;  %v681_v6 = vor.u32 %v785_v1, %v680_v0  ;;  %v656_v7 = vld [vmem:[#allocation5 + $0x20] sm:$0xf]  ;;  %v780_v8 = vld [vmem:[#allocation5 + $0x2c] sm:$0xf0] }
  0x20   :  { %427 = vmatpush.bf16.msra.mxu2 %v713_v46  ;;  %476 = vmatpush.bf16.msra.mxu3 %v717_v50  ;;  %v778_v9 = vld [vmem:[#allocation5 + $0x24] sm:$0xf]  ;;  %v685_v10 = vor.u32 %v783_v2, %v682_v3  ;;  %v658_v11 = vld [vmem:[#allocation5 + $0x30] sm:$0xf0]  ;;  %v664_v12 = vld [vmem:[#allocation5 + $0x28] sm:$0xf]  ;;  %v657_v16 = vor.u32 %v780_v8, %v656_v7 }
  0x21   :  { %v781_v13 = vld [vmem:[#allocation5 + $0x34] sm:$0xf0]  ;;  %v779_v14 = vld [vmem:[#allocation5 + $0x2c] sm:$0xf]  ;;  %v666_v15 = vld [vmem:[#allocation5 + $0x38] sm:$0xf0]  ;;  %v661_v17 = vor.u32 %v778_v9, %v658_v11 }
  0x22   :  { %330 = vmatpush.bf16.msra.mxu0 %v689_v56  ;;  %v665_v18 = vor.u32 %v781_v13, %v664_v12  ;;  %v640_v19 = vld [vmem:[#allocation5] sm:$0xf]  ;;  %v776_v20 = vld [vmem:[#allocation5 + $0xc] sm:$0xf0]  ;;  %v774_v21 = vld [vmem:[#allocation5 + $0x4] sm:$0xf]  ;;  %v669_v22 = vor.u32 %v779_v14, %v666_v15 }
  0x23   :  { %379 = vmatpush.bf16.msra.mxu1 %v693_v57  ;;  %v642_v23 = vld [vmem:[#allocation5 + $0x10] sm:$0xf0]  ;;  %v648_v24 = vld [vmem:[#allocation5 + $0x8] sm:$0xf]  ;;  %v777_v25 = vld [vmem:[#allocation5 + $0x14] sm:$0xf0]  ;;  %v641_v28 = vor.u32 %v776_v20, %v640_v19 }
  0x24   :  { %428 = vmatpush.bf16.msra.mxu2 %v697_v58  ;;  %477 = vmatpush.bf16.msra.mxu3 %v701_v62  ;;  %v775_v26 = vld [vmem:[#allocation5 + $0xc] sm:$0xf]  ;;  %v650_v27 = vld [vmem:[#allocation5 + $0x18] sm:$0xf0]  ;;  %v645_v29 = vor.u32 %v774_v21, %v642_v23  ;;  %v649_v30 = vor.u32 %v777_v25, %v648_v24  ;;  %v766_v32 = vld [vmem:[#allocation2] sm:$0xff]  ;;  %s923_s2 = smov [#allocation8]  }
  0x25   :  { %v653_v31 = vor.u32 %v775_v26, %v650_v27  ;;  %v767_v33 = vld [vmem:[#allocation2 + $0x8] sm:$0xff]  ;;  %v768_v34 = vld [vmem:[#allocation2 + $0x10] sm:$0xff]  ;;  %v769_v35 = vld [vmem:[#allocation2 + $0x18] sm:$0xff]  ;;  %s590_s29 = sshll.u32 %s923_s2, 4  ;;  %s592_s5 = sshll.u32 %s1037_s3, 4  ;;  %s591_s29 = int_to_ptr.vmem [resolvable:$true] %s590_s29  ;;  %s593_s5 = int_to_ptr.hbm [resolvable:$true] %s592_s5 }
  0x26   :  { %331 = vmatpush.bf16.msra.mxu0 %v673_v4  ;;  %v770_v36 = vld [vmem:[#allocation2 + $0x20] sm:$0xff]  ;;  %v771_v37 = vld [vmem:[#allocation2 + $0x28] sm:$0xff]  ;;  %v772_v38 = vld [vmem:[#allocation2 + $0x30] sm:$0xff] }
  0x27   :  { %380 = vmatpush.bf16.msra.mxu1 %v677_v5  ;;  %v773_v39 = vld [vmem:[#allocation2 + $0x38] sm:$0xff]  ;;  %v108_v40 = vld [vmem:[#allocation7] sm:$0xf] }
  0x28   :  { %429 = vmatpush.bf16.msra.mxu2 %v681_v6  ;;  %478 = vmatpush.bf16.msra.mxu3 %v685_v10  ;;  %v956_v41 = vperm.slane %v108_v40, 0  ;;  %v958_v42 = vperm.slane %v108_v40, 1  ;;  %v962_v48 = vperm.slane %v108_v40, 2  ;;  %v964_v49 = vperm.slane %v108_v40, 3 }
  0x2a   :  { %332 = vmatpush.bf16.msra.mxu0 %v657_v16 }
  0x2b   :  { %381 = vmatpush.bf16.msra.mxu1 %v661_v17 }
  0x2c   :  { %430 = vmatpush.bf16.msra.mxu2 %v665_v18  ;;  %479 = vmatpush.bf16.msra.mxu3 %v669_v22 }
  0x2e   :  { %333 = vmatpush.bf16.msra.mxu0 %v641_v28 }
  0x2f   :  { %382 = vmatpush.bf16.msra.mxu1 %v645_v29 }
  0x30   :  { %431 = vmatpush.bf16.msra.mxu2 %v649_v30  ;;  %480 = vmatpush.bf16.msra.mxu3 %v653_v31 }
  0x31   :  { %334 = vmatmul.bf16.vlgmr.msra.gmra.mxu0 %v766_v32 }
  0x32   :  { %383 = vmatmul.bf16.vlgmr.msra.gmra.mxu1 %v766_v32 }
  0x33   :  { %432 = vmatmul.bf16.vlgmr.msra.gmra.mxu2 %v766_v32  ;;  %481 = vmatmul.bf16.vlgmr.msra.gmra.mxu3 %v766_v32 }
  0x41   :  { %339 = vmatmul.bf16.gmra.mxu0 %v767_v33 }
  0x42   :  { %388 = vmatmul.bf16.gmra.mxu1 %v767_v33 }
  0x43   :  { %437 = vmatmul.bf16.gmra.mxu2 %v767_v33  ;;  %486 = vmatmul.bf16.gmra.mxu3 %v767_v33 }
  0x51   :  { %344 = vmatmul.bf16.gmra.mxu0 %v768_v34 }
  0x52   :  { %393 = vmatmul.bf16.gmra.mxu1 %v768_v34 }
  0x53   :  { %442 = vmatmul.bf16.gmra.mxu2 %v768_v34  ;;  %491 = vmatmul.bf16.gmra.mxu3 %v768_v34 }
  0x61   :  { %349 = vmatmul.bf16.gmra.mxu0 %v769_v35 }
  0x62   :  { %398 = vmatmul.bf16.gmra.mxu1 %v769_v35 }
  0x63   :  { %447 = vmatmul.bf16.gmra.mxu2 %v769_v35  ;;  %496 = vmatmul.bf16.gmra.mxu3 %v769_v35 }
  0x71   :  { %354 = vmatmul.bf16.gmra.mxu0 %v770_v36 }
  0x72   :  { %403 = vmatmul.bf16.gmra.mxu1 %v770_v36 }
  0x73   :  { %452 = vmatmul.bf16.gmra.mxu2 %v770_v36  ;;  %501 = vmatmul.bf16.gmra.mxu3 %v770_v36 }
  0x81   :  { %359 = vmatmul.bf16.gmra.mxu0 %v771_v37 }
  0x82   :  { %408 = vmatmul.bf16.gmra.mxu1 %v771_v37 }
  0x83   :  { %457 = vmatmul.bf16.gmra.mxu2 %v771_v37  ;;  %506 = vmatmul.bf16.gmra.mxu3 %v771_v37 }
  0x91   :  { %364 = vmatmul.bf16.gmra.mxu0 %v772_v38 }
  0x92   :  { %413 = vmatmul.bf16.gmra.mxu1 %v772_v38 }
  0x93   :  { %462 = vmatmul.bf16.gmra.mxu2 %v772_v38  ;;  %511 = vmatmul.bf16.gmra.mxu3 %v772_v38 }
  0xa1   :  { %369 = vmatmul.bf16.gmra.mxu0 %v773_v39 }
  0xa2   :  { %418 = vmatmul.bf16.gmra.mxu1 %v773_v39 }
  0xa3   :  { %467 = vmatmul.bf16.gmra.mxu2 %v773_v39  ;;  %516 = vmatmul.bf16.gmra.mxu3 %v773_v39 }
  0xae   :  { %v335_v43 = vpop.f32.mrf.mxu0 }
  0xaf   :  { %v336_v44 = vadd.f32 %v335_v43, %v956_v41  ;;  %v384_v45 = vpop.f32.mrf.mxu1 }
  0xb0   :  { %v385_v46 = vadd.f32 %v384_v45, %v958_v42 }
  0xb2   :  { %v522_v47 = vpack.c.bf16 %v385_v46, %v336_v44 }
  0xb4   :  { %554 = vst [vmem:[#allocation8] sm:$0xff] %v522_v47 }
  0xb6   :  { %v433_v50 = vpop.f32.mrf.mxu2  ;;  %v482_v52 = vpop.f32.mrf.mxu3 }
  0xb7   :  { %v434_v51 = vadd.f32 %v433_v50, %v962_v48  ;;  %v337_v53 = vpop.f32.mrf.mxu0  ;;  %v483_v54 = vadd.f32 %v482_v52, %v964_v49  ;;  %v386_v56 = vpop.f32.mrf.mxu1 }
  0xb8   :  { %v338_v55 = vadd.f32 %v337_v53, %v956_v41  ;;  %v387_v57 = vadd.f32 %v386_v56, %v958_v42 }
  0xb9   :  { %v523_v58 = vpack.c.bf16 %v483_v54, %v434_v51 }
  0xba   :  { %v524_v59 = vpack.c.bf16 %v387_v57, %v338_v55 }
  0xbb   :  { %555 = vst [vmem:[#allocation8 + $0x8] sm:$0xff] %v523_v58 }
  0xbc   :  { %556 = vst [vmem:[#allocation8 + $0x10] sm:$0xff] %v524_v59 }
  0xbe   :  { %v435_v60 = vpop.f32.mrf.mxu2  ;;  %v484_v62 = vpop.f32.mrf.mxu3 }
  0xbf   :  { %v436_v61 = vadd.f32 %v435_v60, %v962_v48  ;;  %v340_v63 = vpop.f32.mrf.mxu0  ;;  %v485_v0 = vadd.f32 %v484_v62, %v964_v49  ;;  %v389_v2 = vpop.f32.mrf.mxu1 }
  0xc0   :  { %v341_v1 = vadd.f32 %v340_v63, %v956_v41  ;;  %v390_v3 = vadd.f32 %v389_v2, %v958_v42 }
  0xc1   :  { %v525_v4 = vpack.c.bf16 %v485_v0, %v436_v61 }
  0xc2   :  { %v526_v5 = vpack.c.bf16 %v390_v3, %v341_v1 }
  0xc3   :  { %557 = vst [vmem:[#allocation8 + $0x18] sm:$0xff] %v525_v4 }
  0xc4   :  { %558 = vst [vmem:[#allocation8 + $0x20] sm:$0xff] %v526_v5 }
  0xc6   :  { %v438_v6 = vpop.f32.mrf.mxu2  ;;  %v487_v8 = vpop.f32.mrf.mxu3 }
  0xc7   :  { %v439_v7 = vadd.f32 %v438_v6, %v962_v48  ;;  %v342_v9 = vpop.f32.mrf.mxu0  ;;  %v488_v10 = vadd.f32 %v487_v8, %v964_v49  ;;  %v391_v12 = vpop.f32.mrf.mxu1 }
  0xc8   :  { %v343_v11 = vadd.f32 %v342_v9, %v956_v41  ;;  %v392_v13 = vadd.f32 %v391_v12, %v958_v42 }
  0xc9   :  { %v527_v14 = vpack.c.bf16 %v488_v10, %v439_v7 }
  0xca   :  { %v528_v15 = vpack.c.bf16 %v392_v13, %v343_v11 }
  0xcb   :  { %559 = vst [vmem:[#allocation8 + $0x28] sm:$0xff] %v527_v14 }
  0xcc   :  { %560 = vst [vmem:[#allocation8 + $0x30] sm:$0xff] %v528_v15 }
  0xce   :  { %v440_v16 = vpop.f32.mrf.mxu2  ;;  %v489_v18 = vpop.f32.mrf.mxu3 }
  0xcf   :  { %v441_v17 = vadd.f32 %v440_v16, %v962_v48  ;;  %v345_v19 = vpop.f32.mrf.mxu0  ;;  %v490_v20 = vadd.f32 %v489_v18, %v964_v49  ;;  %v394_v22 = vpop.f32.mrf.mxu1 }
  0xd0   :  { %v346_v21 = vadd.f32 %v345_v19, %v956_v41  ;;  %v395_v23 = vadd.f32 %v394_v22, %v958_v42 }
  0xd1   :  { %v529_v24 = vpack.c.bf16 %v490_v20, %v441_v17 }
  0xd2   :  { %v530_v25 = vpack.c.bf16 %v395_v23, %v346_v21 }
  0xd3   :  { %561 = vst [vmem:[#allocation8 + $0x38] sm:$0xff] %v529_v24 }
  0xd4   :  { %562 = vst [vmem:[#allocation8 + $0x40] sm:$0xff] %v530_v25 }
  0xd6   :  { %v443_v26 = vpop.f32.mrf.mxu2  ;;  %v492_v28 = vpop.f32.mrf.mxu3 }
  0xd7   :  { %v444_v27 = vadd.f32 %v443_v26, %v962_v48  ;;  %v347_v29 = vpop.f32.mrf.mxu0  ;;  %v493_v30 = vadd.f32 %v492_v28, %v964_v49  ;;  %v396_v32 = vpop.f32.mrf.mxu1 }
  0xd8   :  { %v348_v31 = vadd.f32 %v347_v29, %v956_v41  ;;  %v397_v33 = vadd.f32 %v396_v32, %v958_v42 }
  0xd9   :  { %v531_v34 = vpack.c.bf16 %v493_v30, %v444_v27 }
  0xda   :  { %v532_v35 = vpack.c.bf16 %v397_v33, %v348_v31 }
  0xdb   :  { %563 = vst [vmem:[#allocation8 + $0x48] sm:$0xff] %v531_v34 }
  0xdc   :  { %564 = vst [vmem:[#allocation8 + $0x50] sm:$0xff] %v532_v35 }
  0xde   :  { %v445_v36 = vpop.f32.mrf.mxu2  ;;  %v494_v38 = vpop.f32.mrf.mxu3 }
  0xdf   :  { %v446_v37 = vadd.f32 %v445_v36, %v962_v48  ;;  %v350_v39 = vpop.f32.mrf.mxu0  ;;  %v495_v40 = vadd.f32 %v494_v38, %v964_v49  ;;  %v399_v44 = vpop.f32.mrf.mxu1 }
  0xe0   :  { %v351_v43 = vadd.f32 %v350_v39, %v956_v41  ;;  %v400_v45 = vadd.f32 %v399_v44, %v958_v42 }
  0xe1   :  { %v533_v46 = vpack.c.bf16 %v495_v40, %v446_v37 }
  0xe2   :  { %v534_v47 = vpack.c.bf16 %v400_v45, %v351_v43 }
  0xe3   :  { %565 = vst [vmem:[#allocation8 + $0x58] sm:$0xff] %v533_v46 }
  0xe4   :  { %566 = vst [vmem:[#allocation8 + $0x60] sm:$0xff] %v534_v47 }
  0xe6   :  { %v448_v50 = vpop.f32.mrf.mxu2  ;;  %v497_v52 = vpop.f32.mrf.mxu3 }
  0xe7   :  { %v449_v51 = vadd.f32 %v448_v50, %v962_v48  ;;  %v352_v53 = vpop.f32.mrf.mxu0  ;;  %v498_v54 = vadd.f32 %v497_v52, %v964_v49  ;;  %v401_v56 = vpop.f32.mrf.mxu1 }
  0xe8   :  { %v353_v55 = vadd.f32 %v352_v53, %v956_v41  ;;  %v402_v57 = vadd.f32 %v401_v56, %v958_v42 }
  0xe9   :  { %v535_v58 = vpack.c.bf16 %v498_v54, %v449_v51 }
  0xea   :  { %v536_v59 = vpack.c.bf16 %v402_v57, %v353_v55 }
  0xeb   :  { %567 = vst [vmem:[#allocation8 + $0x68] sm:$0xff] %v535_v58 }
  0xec   :  { %568 = vst [vmem:[#allocation8 + $0x70] sm:$0xff] %v536_v59 }
  0xee   :  { %v450_v60 = vpop.f32.mrf.mxu2  ;;  %v499_v62 = vpop.f32.mrf.mxu3 }
  0xef   :  { %v451_v61 = vadd.f32 %v450_v60, %v962_v48  ;;  %v355_v63 = vpop.f32.mrf.mxu0  ;;  %v500_v0 = vadd.f32 %v499_v62, %v964_v49  ;;  %v404_v2 = vpop.f32.mrf.mxu1 }
  0xf0   :  { %v356_v1 = vadd.f32 %v355_v63, %v956_v41  ;;  %v405_v3 = vadd.f32 %v404_v2, %v958_v42 }
  0xf1   :  { %v537_v4 = vpack.c.bf16 %v500_v0, %v451_v61 }
  0xf2   :  { %v538_v5 = vpack.c.bf16 %v405_v3, %v356_v1 }
  0xf3   :  { %569 = vst [vmem:[#allocation8 + $0x78] sm:$0xff] %v537_v4 }
  0xf4   :  { %570 = vst [vmem:[#allocation8 + $0x80] sm:$0xff] %v538_v5 }
  0xf6   :  { %v453_v6 = vpop.f32.mrf.mxu2  ;;  %v502_v8 = vpop.f32.mrf.mxu3 }
  0xf7   :  { %v454_v7 = vadd.f32 %v453_v6, %v962_v48  ;;  %v357_v9 = vpop.f32.mrf.mxu0  ;;  %v503_v10 = vadd.f32 %v502_v8, %v964_v49  ;;  %v406_v12 = vpop.f32.mrf.mxu1 }
  0xf8   :  { %v358_v11 = vadd.f32 %v357_v9, %v956_v41  ;;  %v407_v13 = vadd.f32 %v406_v12, %v958_v42 }
  0xf9   :  { %v539_v14 = vpack.c.bf16 %v503_v10, %v454_v7 }
  0xfa   :  { %v540_v15 = vpack.c.bf16 %v407_v13, %v358_v11 }
  0xfb   :  { %571 = vst [vmem:[#allocation8 + $0x88] sm:$0xff] %v539_v14 }
  0xfc   :  { %572 = vst [vmem:[#allocation8 + $0x90] sm:$0xff] %v540_v15 }
  0xfe   :  { %v455_v16 = vpop.f32.mrf.mxu2  ;;  %v504_v18 = vpop.f32.mrf.mxu3 }
  0xff   :  { %v456_v17 = vadd.f32 %v455_v16, %v962_v48  ;;  %v360_v19 = vpop.f32.mrf.mxu0  ;;  %v505_v20 = vadd.f32 %v504_v18, %v964_v49  ;;  %v409_v22 = vpop.f32.mrf.mxu1 }
 0x100   :  { %v361_v21 = vadd.f32 %v360_v19, %v956_v41  ;;  %v410_v23 = vadd.f32 %v409_v22, %v958_v42 }
 0x101   :  { %v541_v24 = vpack.c.bf16 %v505_v20, %v456_v17 }
 0x102   :  { %v542_v25 = vpack.c.bf16 %v410_v23, %v361_v21 }
 0x103   :  { %573 = vst [vmem:[#allocation8 + $0x98] sm:$0xff] %v541_v24 }
 0x104   :  { %574 = vst [vmem:[#allocation8 + $0xa0] sm:$0xff] %v542_v25 }
 0x106   :  { %v458_v26 = vpop.f32.mrf.mxu2  ;;  %v507_v28 = vpop.f32.mrf.mxu3 }
 0x107   :  { %v459_v27 = vadd.f32 %v458_v26, %v962_v48  ;;  %v362_v29 = vpop.f32.mrf.mxu0  ;;  %v508_v30 = vadd.f32 %v507_v28, %v964_v49  ;;  %v411_v32 = vpop.f32.mrf.mxu1 }
 0x108   :  { %v363_v31 = vadd.f32 %v362_v29, %v956_v41  ;;  %v412_v33 = vadd.f32 %v411_v32, %v958_v42 }
 0x109   :  { %v543_v34 = vpack.c.bf16 %v508_v30, %v459_v27 }
 0x10a   :  { %v544_v35 = vpack.c.bf16 %v412_v33, %v363_v31 }
 0x10b   :  { %575 = vst [vmem:[#allocation8 + $0xa8] sm:$0xff] %v543_v34 }
 0x10c   :  { %576 = vst [vmem:[#allocation8 + $0xb0] sm:$0xff] %v544_v35 }
 0x10e   :  { %v460_v36 = vpop.f32.mrf.mxu2  ;;  %v509_v38 = vpop.f32.mrf.mxu3 }
 0x10f   :  { %v461_v37 = vadd.f32 %v460_v36, %v962_v48  ;;  %v365_v39 = vpop.f32.mrf.mxu0  ;;  %v510_v40 = vadd.f32 %v509_v38, %v964_v49  ;;  %v414_v44 = vpop.f32.mrf.mxu1 }
 0x110   :  { %v366_v43 = vadd.f32 %v365_v39, %v956_v41  ;;  %v415_v45 = vadd.f32 %v414_v44, %v958_v42 }
 0x111   :  { %v545_v46 = vpack.c.bf16 %v510_v40, %v461_v37 }
 0x112   :  { %v546_v47 = vpack.c.bf16 %v415_v45, %v366_v43 }
 0x113   :  { %577 = vst [vmem:[#allocation8 + $0xb8] sm:$0xff] %v545_v46 }
 0x114   :  { %578 = vst [vmem:[#allocation8 + $0xc0] sm:$0xff] %v546_v47 }
 0x116   :  { %v463_v50 = vpop.f32.mrf.mxu2  ;;  %v512_v52 = vpop.f32.mrf.mxu3 }
 0x117   :  { %v464_v51 = vadd.f32 %v463_v50, %v962_v48  ;;  %v367_v53 = vpop.f32.mrf.mxu0  ;;  %v513_v54 = vadd.f32 %v512_v52, %v964_v49  ;;  %v416_v56 = vpop.f32.mrf.mxu1 }
 0x118   :  { %v368_v55 = vadd.f32 %v367_v53, %v956_v41  ;;  %v417_v57 = vadd.f32 %v416_v56, %v958_v42 }
 0x119   :  { %v547_v58 = vpack.c.bf16 %v513_v54, %v464_v51 }
 0x11a   :  { %v548_v59 = vpack.c.bf16 %v417_v57, %v368_v55 }
 0x11b   :  { %579 = vst [vmem:[#allocation8 + $0xc8] sm:$0xff] %v547_v58 }
 0x11c   :  { %580 = vst [vmem:[#allocation8 + $0xd0] sm:$0xff] %v548_v59 }
 0x11e   :  { %v465_v60 = vpop.f32.mrf.mxu2  ;;  %v514_v62 = vpop.f32.mrf.mxu3 }
 0x11f   :  { %v466_v61 = vadd.f32 %v465_v60, %v962_v48  ;;  %v370_v63 = vpop.f32.mrf.mxu0  ;;  %v515_v0 = vadd.f32 %v514_v62, %v964_v49  ;;  %v419_v2 = vpop.f32.mrf.mxu1 }
 0x120   :  { %v371_v1 = vadd.f32 %v370_v63, %v956_v41  ;;  %v420_v3 = vadd.f32 %v419_v2, %v958_v42 }
 0x121   :  { %v549_v4 = vpack.c.bf16 %v515_v0, %v466_v61 }
 0x122   :  { %v550_v5 = vpack.c.bf16 %v420_v3, %v371_v1 }
 0x123   :  { %581 = vst [vmem:[#allocation8 + $0xd8] sm:$0xff] %v549_v4 }
 0x124   :  { %582 = vst [vmem:[#allocation8 + $0xe0] sm:$0xff] %v550_v5 }
 0x126   :  { %v468_v6 = vpop.f32.mrf.mxu2  ;;  %v517_v8 = vpop.f32.mrf.mxu3 }
 0x127   :  { %v469_v7 = vadd.f32 %v468_v6, %v962_v48  ;;  %v372_v9 = vpop.f32.mrf.mxu0  ;;  %v518_v10 = vadd.f32 %v517_v8, %v964_v49  ;;  %v421_v12 = vpop.f32.mrf.mxu1 }
 0x128   :  { %v373_v11 = vadd.f32 %v372_v9, %v956_v41  ;;  %v422_v13 = vadd.f32 %v421_v12, %v958_v42 }
 0x129   :  { %v551_v14 = vpack.c.bf16 %v518_v10, %v469_v7 }
 0x12a   :  { %v552_v15 = vpack.c.bf16 %v422_v13, %v373_v11 }
 0x12b   :  { %583 = vst [vmem:[#allocation8 + $0xe8] sm:$0xff] %v551_v14 }
 0x12c   :  { %584 = vst [vmem:[#allocation8 + $0xf0] sm:$0xff] %v552_v15 }
 0x12e   :  { %v470_v16 = vpop.f32.mrf.mxu2  ;;  %v519_v18 = vpop.f32.mrf.mxu3 }
 0x12f   :  { %v471_v17 = vadd.f32 %v470_v16, %v962_v48  ;;  %v520_v19 = vadd.f32 %v519_v18, %v964_v49 }
 0x131   :  { %v553_v41 = vpack.c.bf16 %v520_v19, %v471_v17 }
 0x133   :  { %585 = vst [vmem:[#allocation8 + $0xf8] sm:$0xff] %v553_v41 }
 0x134   :  { %598 = dma.vmem_to_hbm [thread:$0]  %s591_s29, 4096, %s593_s5, [#allocation4], %s917_s20, %s917_s20, %s918_s21  }
 0x135   :  { %914 = dma.done.wait [#allocation4], 4096  }
 0x136   :  { %915 = vsyncadd [#allocation4], 4294963200 }
 0x137   :  { %603 = vsyncpa [#allocation3], 1 }
 0x138   :  { %604 = vsyncpa [#allocation6], 1 }
 0x139   :  { %605 = vsyncpa [#allocation4], 1 }

</bundles_post_ra>
